<compile_context>
chip_gen: v7x
topology: tpu7x:2x2x1
jax: 0.10.0
libtpu: 0.0.40
codegen_flags: <defaults>
</compile_context>

<pallas_src>
import functools

import jax
import jax.numpy as jnp
from jax.experimental import pallas as pl
from jax.experimental.pallas import tpu as pltpu


def _convlstm_kernel(z_ref, c_ref, w_ref, h_out_ref, c_out_ref, *, ch):
    """Fused ConvLSTM cell, one batch-group per grid step.

    z_ref     : [1, Kp, L]   bf16  im2col operand (taps x channels, +1s row, zero pad)
    c_ref     : [1, Ch, L]   f32   cell state (batch folded into lanes)
    w_ref     : [4*Ch, Kp]   bf16  fused conv weight (+bias column, zero pad)
    h_out_ref : [1, Ch, L]   bf16
    c_out_ref : [1, Ch, L]   f32
    """
    # Single MXU pass: conv (both input and hidden paths) + bias, f32 accumulation.
    acc = jnp.dot(w_ref[...], z_ref[0], preferred_element_type=jnp.float32)  # [4Ch, L]

    # Gate split on the sublane axis (8-aligned rows), math in f32.
    i = jax.nn.sigmoid(acc[0 * ch:1 * ch, :])
    f = jax.nn.sigmoid(acc[1 * ch:2 * ch, :])
    o = jax.nn.sigmoid(acc[2 * ch:3 * ch, :])
    g = jnp.tanh(acc[3 * ch:4 * ch, :])

    c_cur = c_ref[0]
    c_next = f * c_cur + i * g
    h_next = o * jnp.tanh(c_next)

    h_out_ref[0] = h_next.astype(h_out_ref.dtype)   # bf16 writeback
    c_out_ref[0] = c_next                           # f32, aliased in place


def conv_lstm_cell(x, h, c, wx, wh, bx, bh):
    """One ConvLSTMCell step.

    x: [B, H, W, Cin], h/c: [B, H, W, Ch]
    wx: [kh, kw, Cin, 4*Ch], wh: [kh, kw, Ch, 4*Ch], bx/bh: [4*Ch]
    Returns (h_next, c_next), each [B, H, W, Ch] float32.
    """
    B, H, W, Cin = x.shape
    Ch = h.shape[-1]
    kh, kw = wx.shape[0], wx.shape[1]
    ph, pw = kh // 2, kw // 2
    Cz = Cin + Ch
    C4 = 4 * Ch
    M = H * W                                   # spatial size per batch element
    K = kh * kw * Cz                            # im2col contraction depth
    Kp = ((K + 1 + 127) // 128) * 128           # +1 bias row, padded to 128 multiple

    # Batch grouping: keep >=2 "parallel" grid steps when possible (v7x has two
    # TensorCores), while folding the rest of the batch into the lane dimension
    # so each step has plenty of work and lane-dense (multiple-of-128) stores.
    if B >= 2:
        G = 2 if B % 2 == 0 else B
    else:
        G = 1
    Bt = B // G
    L = Bt * M

    # ---- wrapper-side layout plumbing (one-time per cell call) ----
    # im2col of the fused x/h operand.
    z = jnp.concatenate([x, h], axis=-1)                           # [B, H, W, Cz]
    zp = jnp.pad(z, ((0, 0), (ph, ph), (pw, pw), (0, 0)))          # [B, Hp, Wp, Cz]
    taps = [zp[:, dy:dy + H, dx:dx + W, :]
            for dy in range(kh) for dx in range(kw)]               # kh*kw x [B, H, W, Cz]
    zc = jnp.stack(taps, axis=1)                                   # [B, kh*kw, H, W, Cz]
    zc = jnp.transpose(zc, (0, 1, 4, 2, 3)).reshape(B, K, M)       # [B, K, M]
    ones = jnp.ones((B, 1, M), zc.dtype)                           # bias row
    zpad = jnp.zeros((B, Kp - K - 1, M), zc.dtype)                 # K alignment pad
    zc = jnp.concatenate([zc, ones, zpad], axis=1)                 # [B, Kp, M]
    # Fold batch into lanes: [G, Kp, Bt*M], bf16 MXU operand.
    zc = zc.reshape(G, Bt, Kp, M).transpose(0, 2, 1, 3).reshape(G, Kp, L)
    zc = zc.astype(jnp.bfloat16)

    # Fused conv weight with bias column: [4*Ch, Kp], bf16.
    w = jnp.concatenate([wx, wh], axis=2)                          # [kh, kw, Cz, 4Ch]
    w = jnp.transpose(w, (3, 0, 1, 2)).reshape(C4, K)              # [4Ch, K]
    b = (bx + bh).reshape(C4, 1)
    wpad = jnp.zeros((C4, Kp - K - 1), w.dtype)
    w = jnp.concatenate([w, b, wpad], axis=1).astype(jnp.bfloat16) # [4Ch, Kp]

    # Cell state in kernel layout: [G, Ch, Bt*M], f32 (aliased to the c output).
    cT = jnp.transpose(c, (0, 3, 1, 2)).reshape(B, Ch, M)
    cT = cT.reshape(G, Bt, Ch, M).transpose(0, 2, 1, 3).reshape(G, Ch, L)
    cT = cT.astype(jnp.float32)

    kernel = functools.partial(_convlstm_kernel, ch=Ch)

    h_flat, c_flat = pl.pallas_call(
        kernel,
        grid=(G,),
        in_specs=[
            pl.BlockSpec((1, Kp, L), lambda g: (g, 0, 0)),     # im2col operand
            pl.BlockSpec((1, Ch, L), lambda g: (g, 0, 0)),     # cell state
            pl.BlockSpec((C4, Kp), lambda g: (0, 0)),          # weights (resident)
        ],
        out_specs=(
            pl.BlockSpec((1, Ch, L), lambda g: (g, 0, 0)),     # h_next (bf16)
            pl.BlockSpec((1, Ch, L), lambda g: (g, 0, 0)),     # c_next (f32)
        ),
        out_shape=(
            jax.ShapeDtypeStruct((G, Ch, L), jnp.bfloat16),
            jax.ShapeDtypeStruct((G, Ch, L), jnp.float32),
        ),
        input_output_aliases={1: 1},                           # c updated in place
        compiler_params=pltpu.CompilerParams(
            dimension_semantics=("parallel",)),
    )(zc, cT, w)

    # Unfold back to NHWC.
    def unfold(a):
        a = a.reshape(G, Ch, Bt, H, W)
        a = jnp.transpose(a, (0, 2, 3, 4, 1)).reshape(B, H, W, Ch)
        return a

    h_next = unfold(h_flat).astype(jnp.float32)
    c_next = unfold(c_flat)
    return h_next, c_next


if __name__ == "__main__":
    B, Cin, Ch, H, W = 2, 4, 8, 16, 16      # hidden_dim=8 -> 4*hidden=32 gate channels
    kh = kw = 3

    key = jax.random.PRNGKey(0)
    ks = jax.random.split(key, 7)
    x = jax.random.normal(ks[0], (B, H, W, Cin), jnp.float32)
    h = jax.random.normal(ks[1], (B, H, W, Ch), jnp.float32)
    c = jax.random.normal(ks[2], (B, H, W, Ch), jnp.float32)
    # deterministic synthetic parameters (nn.Conv2d shapes, stored as HWIO)
    wx = jax.random.normal(ks[3], (kh, kw, Cin, 4 * Ch), jnp.float32) * 0.1
    wh = jax.random.normal(ks[4], (kh, kw, Ch, 4 * Ch), jnp.float32) * 0.1
    bx = jax.random.normal(ks[5], (4 * Ch,), jnp.float32) * 0.1
    bh = jax.random.normal(ks[6], (4 * Ch,), jnp.float32) * 0.1

    h_next, c_next = conv_lstm_cell(x, h, c, wx, wh, bx, bh)
    jax.block_until_ready((h_next, c_next))

    # Pure-JAX reference (same math as the PyTorch module).  The kernel uses
    # bf16 matmul operands (weights, x/h, bias folded into the matmul) with f32
    # accumulation and emits h in bf16, so round the same quantities in the
    # reference and keep a tight tolerance.
    xb = x.astype(jnp.bfloat16).astype(jnp.float32)
    hb = h.astype(jnp.bfloat16).astype(jnp.float32)
    wxb = wx.astype(jnp.bfloat16).astype(jnp.float32)
    whb = wh.astype(jnp.bfloat16).astype(jnp.float32)
    bsum = (bx + bh).astype(jnp.bfloat16).astype(jnp.float32)

    def conv_same(inp, w):
        return jax.lax.conv_general_dilated(
            inp, w, window_strides=(1, 1),
            padding=[(kh // 2, kh // 2), (kw // 2, kw // 2)],
            dimension_numbers=("NHWC", "HWIO", "NHWC"))

    gates = conv_same(xb, wxb) + conv_same(hb, whb) + bsum
    i_g = jax.nn.sigmoid(gates[..., 0 * Ch:1 * Ch])
    f_g = jax.nn.sigmoid(gates[..., 1 * Ch:2 * Ch])
    o_g = jax.nn.sigmoid(gates[..., 2 * Ch:3 * Ch])
    g_g = jnp.tanh(gates[..., 3 * Ch:4 * Ch])
    c_ref_out = f_g * c + i_g * g_g
    h_ref_out = o_g * jnp.tanh(c_ref_out)      # kernel h is bf16-rounded; |h|<1 so
                                               # rounding error < 1e-3, within tolerance

    assert jnp.allclose(c_next, c_ref_out, atol=2e-3, rtol=2e-3)
    assert jnp.allclose(h_next, h_ref_out, atol=3e-3, rtol=3e-3)
    print("KERNEL_OK")
</pallas_src>

<mosaic_0001>
module attributes {stable_mosaic.version = 11 : i64} {
  func.func @_convlstm_kernel(%arg0: i32, %arg1: memref<1x128x256xbf16, #tpu.memory_space<vmem>>, %arg2: memref<1x8x256xf32, #tpu.memory_space<vmem>>, %arg3: memref<32x128xbf16, #tpu.memory_space<vmem>>, %arg4: memref<1x8x256xbf16, #tpu.memory_space<vmem>>, %arg5: memref<1x8x256xf32, #tpu.memory_space<vmem>>) attributes {dimension_semantics = [#tpu.dimension_semantics<parallel>], iteration_bounds = array<i64: 2>, scalar_prefetch = 0 : i64, scratch_operands = 0 : i64, tpu.core_type = #tpu.core_type<tc>, window_params = [{transform_indices = @transform_0, window_bounds = array<i64: 1, 128, 256>}, {transform_indices = @transform_1, window_bounds = array<i64: 1, 8, 256>}, {pipeline_mode = #tpu.pipeline_mode<synchronous>, transform_indices = @transform_2, window_bounds = array<i64: 32, 128>}, {transform_indices = @transform_3, window_bounds = array<i64: 1, 8, 256>}, {transform_indices = @transform_4, window_bounds = array<i64: 1, 8, 256>}]} {
    %c0 = arith.constant 0 : index
    %c0_0 = arith.constant 0 : index
    %0 = vector.load %arg3[%c0, %c0_0] : memref<32x128xbf16, #tpu.memory_space<vmem>>, vector<32x128xbf16>
    %c0_1 = arith.constant 0 : index
    %c0_2 = arith.constant 0 : index
    %c0_3 = arith.constant 0 : index
    %1 = vector.load %arg1[%c0_1, %c0_2, %c0_3] : memref<1x128x256xbf16, #tpu.memory_space<vmem>>, vector<1x128x256xbf16>
    %2 = vector.shape_cast %1 : vector<1x128x256xbf16> to vector<128x256xbf16>
    %cst = arith.constant dense<0.000000e+00> : vector<32x256xf32>
    %3 = tpu.matmul %0, %2, %cst {dimension_numbers = #tpu.dot_dimension_numbers<[1], [0], [0], [1], [0, 0, 1, 1], [], []>} : vector<32x128xbf16>, vector<128x256xbf16>, vector<32x256xf32> -> vector<32x256xf32>
    %4 = vector.extract_strided_slice %3 {offsets = [0, 0], sizes = [8, 256], strides = [1, 1]} : vector<32x256xf32> to vector<8x256xf32>
    %5 = arith.negf %4 : vector<8x256xf32>
    %6 = math.exp %5 : vector<8x256xf32>
    %cst_4 = arith.constant 1.000000e+00 : f32
    %7 = vector.broadcast %cst_4 : f32 to vector<8x256xf32>
    %8 = arith.addf %7, %6 : vector<8x256xf32>
    %9 = arith.divf %7, %8 : vector<8x256xf32>
    %10 = vector.extract_strided_slice %3 {offsets = [8, 0], sizes = [8, 256], strides = [1, 1]} : vector<32x256xf32> to vector<8x256xf32>
    %11 = arith.negf %10 : vector<8x256xf32>
    %12 = math.exp %11 : vector<8x256xf32>
    %cst_5 = arith.constant 1.000000e+00 : f32
    %13 = vector.broadcast %cst_5 : f32 to vector<8x256xf32>
    %14 = arith.addf %13, %12 : vector<8x256xf32>
    %15 = arith.divf %13, %14 : vector<8x256xf32>
    %16 = vector.extract_strided_slice %3 {offsets = [16, 0], sizes = [8, 256], strides = [1, 1]} : vector<32x256xf32> to vector<8x256xf32>
    %17 = arith.negf %16 : vector<8x256xf32>
    %18 = math.exp %17 : vector<8x256xf32>
    %cst_6 = arith.constant 1.000000e+00 : f32
    %19 = vector.broadcast %cst_6 : f32 to vector<8x256xf32>
    %20 = arith.addf %19, %18 : vector<8x256xf32>
    %21 = arith.divf %19, %20 : vector<8x256xf32>
    %22 = vector.extract_strided_slice %3 {offsets = [24, 0], sizes = [8, 256], strides = [1, 1]} : vector<32x256xf32> to vector<8x256xf32>
    %23 = math.tanh %22 : vector<8x256xf32>
    %c0_7 = arith.constant 0 : index
    %c0_8 = arith.constant 0 : index
    %c0_9 = arith.constant 0 : index
    %24 = vector.load %arg2[%c0_7, %c0_8, %c0_9] : memref<1x8x256xf32, #tpu.memory_space<vmem>>, vector<1x8x256xf32>
    %25 = vector.shape_cast %24 : vector<1x8x256xf32> to vector<8x256xf32>
    %26 = arith.mulf %15, %25 : vector<8x256xf32>
    %27 = arith.mulf %9, %23 : vector<8x256xf32>
    %28 = arith.addf %26, %27 : vector<8x256xf32>
    %29 = math.tanh %28 : vector<8x256xf32>
    %30 = arith.mulf %21, %29 : vector<8x256xf32>
    %31 = arith.truncf %30 : vector<8x256xf32> to vector<8x256xbf16>
    %c0_10 = arith.constant 0 : index
    %c0_11 = arith.constant 0 : index
    %c0_12 = arith.constant 0 : index
    %32 = vector.load %arg4[%c0_10, %c0_11, %c0_12] : memref<1x8x256xbf16, #tpu.memory_space<vmem>>, vector<1x8x256xbf16>
    %33 = vector.shape_cast %32 : vector<1x8x256xbf16> to vector<8x256xbf16>
    %34 = vector.shape_cast %31 : vector<8x256xbf16> to vector<1x8x256xbf16>
    tpu.vector_store %arg4[%c0_10, %c0_11, %c0_12], %34 {strides = array<i32>} : memref<1x8x256xbf16, #tpu.memory_space<vmem>>, vector<1x8x256xbf16>,
    %c0_13 = arith.constant 0 : index
    %c0_14 = arith.constant 0 : index
    %c0_15 = arith.constant 0 : index
    %35 = vector.load %arg5[%c0_13, %c0_14, %c0_15] : memref<1x8x256xf32, #tpu.memory_space<vmem>>, vector<1x8x256xf32>
    %36 = vector.shape_cast %35 : vector<1x8x256xf32> to vector<8x256xf32>
    %37 = vector.shape_cast %28 : vector<8x256xf32> to vector<1x8x256xf32>
    tpu.vector_store %arg5[%c0_13, %c0_14, %c0_15], %37 {strides = array<i32>} : memref<1x8x256xf32, #tpu.memory_space<vmem>>, vector<1x8x256xf32>,
    return
  }
  func.func @transform_0(%arg0: i32) -> (i32, i32, i32) {
    %c0_i32 = arith.constant 0 : i32
    %c0_i32_0 = arith.constant 0 : i32
    %c0_i32_1 = arith.constant 0 : i32
    return %arg0, %c0_i32, %c0_i32_0 : i32, i32, i32
  }
  func.func @transform_1(%arg0: i32) -> (i32, i32, i32) {
    %c0_i32 = arith.constant 0 : i32
    %c0_i32_0 = arith.constant 0 : i32
    %c0_i32_1 = arith.constant 0 : i32
    return %arg0, %c0_i32, %c0_i32_0 : i32, i32, i32
  }
  func.func @transform_2(%arg0: i32) -> (i32, i32) {
    %c0_i32 = arith.constant 0 : i32
    %c0_i32_0 = arith.constant 0 : i32
    %c0_i32_1 = arith.constant 0 : i32
    return %c0_i32, %c0_i32_0 : i32, i32
  }
  func.func @transform_3(%arg0: i32) -> (i32, i32, i32) {
    %c0_i32 = arith.constant 0 : i32
    %c0_i32_0 = arith.constant 0 : i32
    %c0_i32_1 = arith.constant 0 : i32
    return %arg0, %c0_i32, %c0_i32_0 : i32, i32, i32
  }
  func.func @transform_4(%arg0: i32) -> (i32, i32, i32) {
    %c0_i32 = arith.constant 0 : i32
    %c0_i32_0 = arith.constant 0 : i32
    %c0_i32_1 = arith.constant 0 : i32
    return %arg0, %c0_i32, %c0_i32_0 : i32, i32, i32
  }
}

</mosaic_0001>

<bundles_post_ra>
// kernel: tpu_custom_call.1
= control target key start
LH: loop header
LB: loop body
LE: loop exit
PB: predicated region body
PF: predicated region fallthrough
CT: control target
= control target key end

     0   :  { %10 = vsyncpa [#allocation3], 0  ;;  %s1297_s0 = inlined_call_operand.hbm [shape: bf16[2,128,256], index: 0, kind: input, shape index: {}]   ;;  %s1298_s1 = inlined_call_operand.hbm [shape: f32[2,8,256], index: 1, kind: input, shape index: {}, may-alias: {1,4}]   ;;  %s1299_s2 = inlined_call_operand.vmem [shape: bf16[32,128], index: 2, kind: input, shape index: {}]   ;;  %s1300_s3 = inlined_call_operand.hbm [shape: bf16[2,8,256], index: 3, kind: output, shape index: {0}]   ;;  %s1301_s4 = inlined_call_operand.hbm [shape: f32[2,8,256], index: 4, kind: output, shape index: {1}, may-alias: {1,4}]  }
   0x1   :  { %12 = vsyncpa [#allocation3 + $0x1], 0 }
   0x2   :  { %13 = vsyncpa [#allocation6], 0 }
   0x3   :  { %15 = vsyncpa [#allocation6 + $0x1], 0 }
   0x4   :  { %16 = vsyncpa [#allocation4], 0 }
   0x5   :  { %18 = vsyncpa [#allocation4 + $0x1], 0 }
   0x6   :  { %19 = vsyncpa [#allocation9], 0 }
   0x7   :  { %21 = vsyncpa [#allocation9 + $0x1], 0  ;;  %s1032_s15 = smov 0   ;;  %s1034_s16 = smov 0  }
   0x8   :  { %s1036_s17 = smov 0   ;;  %s1038_s18 = smov 0  }
   0x9 LB: > { %s1053_s19 = sadd.s32 4294967295, %s998_s18   ;;  %s651_s20 = sadd.s32 4294967294, %s998_s18   ;;  %s998_s18 = sphi %s1038_s18, %s1318_s18   ;;  %s994_s17 = sphi %s1036_s17, %s1317_s17   ;;  %s990_s16 = sphi %s1034_s16, %s1316_s16   ;;  %s986_s15 = sphi %s1032_s15, %s1315_s15  }
   0xa   : > { %s1057_s21 = sadd.s32 1, %s998_s18   ;;  %s34_s22 = sadd.s32 1, %s994_s17 }
   0xb   : > { %s31_s23 = ssub.s32 %s998_s18, %s1057_s21  ;;  %p41_p0 = scmp.ne.s32.totalorder %s994_s17, %s990_s16 }
   0xc   : > { %p32_p1 = scmp.eq.s32.totalorder %s31_s23, 0  ;;  %p42_p2 = scmp.eq.s32.totalorder %s998_s18, 0 }
   0xd   : > { %p47_p3 = scmp.ne.s32.totalorder %s990_s16, %s986_s15  ;;  %p48_p4 = scmp.eq.s32.totalorder %s1053_s19, 0 }
   0xe   : > { %s1069_s24 = scalar_select %p32_p1, %s994_s17, %s34_s22  }
   0xf   : > { %p1071_p5 = por %p42_p2, %p41_p0  ;;  %p1075_p6 = por %p48_p4, %p47_p3 }
  0x10   : > { %p118_p7 = scmp.eq.s32.totalorder %s1053_s19, 1  ;;  %p124_p8 = scmp.eq.s32.totalorder %s651_s20, 1 }
  0x11   : > { %s1305_s26 = scalar_select %p1075_p6, 1, 0 }
  0x12   : > { %p741_p10 = scmp.lt.s32.totalorder %s998_s18, 2  ;;  %p1082_p11 = por %p118_p7, %p41_p0 }
  0x13   : > { %p1086_p12 = por %p124_p8, %p47_p3  ;;  %s1091_s29 = sand.u32 1, %s994_s17  }
  0x14   : > { %s1306_s27 = scalar_select %p1082_p11, 1, 0 }
  0x15   : > { %s1307_s28 = scalar_select %p1086_p12, 1, 0 }
  0x16   : > { %s698_s30 = sshll.u32 %s998_s18, 11  ;;  %s654_s5 = sshll.u32 %s1091_s29, 7 }
  0x17   : > { %s1098_s8 = scalar_lea.hbm %s1297_s0, %s698_s30  ;;  %s177_s9 = scalar_lea.vmem [#allocation2], %s654_s5 }
  0x18   : > { %s184_s10 = sshll.u32 %s177_s9, 4  ;;  %p1102_p13 = pnand %p741_p10, %p1071_p5  ;;  %s1106_s10 = int_to_ptr.vmem [resolvable:$true] %s184_s10 }
  0x19   : > { %s174_s12 = scalar_lea.sflag [#allocation3], %s1091_s29  ;;  %s836_s13 = scalar_lea.hbm %s1098_s8, 2048 }
  0x1a   : > { %p837_p0 = scmp.ne.s32.totalorder %s1098_s8, %s836_s13  ;;  %p838_p1 = pneg %p1102_p13 }
  0x1b   : > { %s841_s22 = scalar_lea.hbm %s1297_s0, 4096  ;;  %p842_p4 = scmp.lt.u32.totalorder %s1098_s8, %s1297_s0 }
  0x1c   : > { %p839_p2 = pnand %p838_p1, %p837_p0  ;;  %p843_p5 = scmp.lt.u32.totalorder %s841_s22, %s836_s13 }
  0x1d   : > { %p845_p8 = scmp.lt.u32.totalorder %s836_s13, %s1098_s8 }
  0x1e   : > { %p840_p3 = pneg %p839_p2  ;;  %p844_p7 = por %p843_p5, %p842_p4 }
  0x20   : > { %p846_p10 = por %p845_p8, %p844_p7 }
  0x22   : > { %p847_p9 = pnand %p846_p10, %p840_p3 }
  0x24   : > { %850 = shalt.err (!%p847_p9)
}
  0x25   : > { %s851_s30 = scalar_lea.vmem %s1106_s10, 2048  ;;  %s1000_s5 = smov [#allocation2]  }
  0x26   : > { %p852_p0 = scmp.ne.s32.totalorder %s1106_s10, %s851_s30  ;;  %s856_s6 = sshll.u32 %s1000_s5, 4  ;;  %s857_s6 = int_to_ptr.vmem [resolvable:$false] %s856_s6 }
  0x27   : > { %s858_s7 = scalar_lea.vmem %s857_s6, 4096  ;;  %p859_p11 = scmp.lt.s32.totalorder %s1106_s10, %s857_s6 }
  0x28   : > { %p854_p2 = pnand %p852_p0, %p838_p1  ;;  %p860_p4 = scmp.lt.s32.totalorder %s858_s7, %s851_s30 }
  0x2a   : > { %p855_p12 = pneg %p854_p2  ;;  %p861_p5 = por %p860_p4, %p859_p11 }
  0x2c   : > { %p862_p7 = pnand %p861_p5, %p855_p12 }
  0x2e   : > { %865 = shalt.err (!%p862_p7)
}
  0x2f   : > { %s1001_s9 = smov 128   ;;  %s1002_s13 = smov 8  }
  0x30   : > { %730 = dma.hbm_to_vmem [thread:$0]  (!%p1102_p13), %s1098_s8, 2048, %s1106_s10, %s174_s12, %s1001_s9, %s1001_s9, %s1002_s13  }
  0x31   : > { %p660_p9 = scmp.ge.s32.totalorder %s998_s18, 1  ;;  %p211_p3 = scmp.lt.s32.totalorder %s998_s18, 3 }
  0x32   : > { %s657_s14 = sshll.u32 %s1091_s29, 4  ;;  %s699_s22 = sshll.u32 %s998_s18, 8 }
  0x33   : > { %p1139_p11 = pnand %p660_p9, %p211_p3  ;;  %s198_s23 = scalar_lea.vmem [#allocation5], %s657_s14 }
  0x34   : > { %s206_s25 = sshll.u32 %s198_s23, 4  ;;  %s1147_s6 = scalar_lea.hbm %s1298_s1, %s699_s22  ;;  %s207_s25 = int_to_ptr.vmem [resolvable:$true] %s206_s25 }
  0x35   : > { %s1309_s20 = scalar_select %p1139_p11, 1, 0 }
  0x36   : > { %s195_s8 = scalar_lea.sflag [#allocation6], %s1091_s29  ;;  %s866_s10 = scalar_lea.hbm %s1147_s6, 256 }
  0x37   : > { %p867_p12 = scmp.ne.s32.totalorder %s1147_s6, %s866_s10  ;;  %s871_s9 = scalar_lea.hbm %s1298_s1, 512 }
  0x38   : > { %p872_p0 = scmp.lt.u32.totalorder %s1147_s6, %s1298_s1  ;;  %p873_p2 = scmp.lt.u32.totalorder %s871_s9, %s866_s10 }
  0x39   : > { %p869_p8 = pnand %p867_p12, %p838_p1  ;;  %p875_p5 = scmp.lt.u32.totalorder %s866_s10, %s1147_s6 }
  0x3a   : > { %p874_p4 = por %p873_p2, %p872_p0 }
  0x3b   : > { %p870_p10 = pneg %p869_p8 }
  0x3c   : > { %p876_p7 = por %p875_p5, %p874_p4 }
  0x3e   : > { %p877_p9 = pnand %p876_p7, %p870_p10 }
  0x40   : > { %880 = shalt.err (!%p877_p9)
}
  0x41   : > { %s881_s29 = scalar_lea.vmem %s207_s25, 256  ;;  %s1003_s22 = smov [#allocation5]  }
  0x42   : > { %p882_p3 = scmp.ne.s32.totalorder %s207_s25, %s881_s29  ;;  %s886_s23 = sshll.u32 %s1003_s22, 4  ;;  %s887_s23 = int_to_ptr.vmem [resolvable:$false] %s886_s23 }
  0x43   : > { %s888_s30 = scalar_lea.vmem %s887_s23, 512  ;;  %p889_p6 = scmp.lt.s32.totalorder %s207_s25, %s887_s23 }
  0x44   : > { %p884_p12 = pnand %p882_p3, %p838_p1  ;;  %p890_p11 = scmp.lt.s32.totalorder %s888_s30, %s881_s29 }
  0x46   : > { %p885_p8 = pneg %p884_p12  ;;  %p891_p0 = por %p890_p11, %p889_p6 }
  0x48   : > { %p892_p2 = pnand %p891_p0, %p885_p8 }
  0x4a   : > { %895 = shalt.err (!%p892_p2)
}
  0x4b   : > { %733 = dma.hbm_to_vmem [thread:$0]  (!%p1102_p13), %s1147_s6, 256, %s207_s25, %s195_s8  }
  0x4c   : > { %p1310_p10 = scmp.ne.s32.totalorder %s1309_s20, 0 }
  0x4d   : > { %s1172_s5 = sand.u32 (!%p1310_p10), 1, %s990_s16   ;;  %p1311_p6 = scmp.ne.s32.totalorder (!%p1310_p10), %s1305_s26, 0 }
  0x4e   : > { %215 = sbr.rel (%p1310_p10) target bundleno = 407 (0x197), region = 32  ;;  %s661_s10 = sshll.u32 (!%p1310_p10), %s1172_s5, 7 }
  0x4f   : > { %s218_s12 = scalar_lea.sflag (!%p1310_p10), [#allocation3], %s1172_s5  ;;  %s1176_s7 = scalar_lea.vmem (!%p1310_p10), [#allocation2], %s661_s10 }
  0x55   : > { %969 = dma.done.wait (%p1311_p6), %s218_s12, 2048  }
  0x56   : > { %971 = vsyncadd (%p1311_p6), %s218_s12, 4294965248  ;;  %s662_s11 = sshll.u32 %s1172_s5, 4  ;;  %s227_s20 = scalar_lea.sflag [#allocation6], %s1172_s5 }
  0x57   : > { %s1186_s25 = scalar_lea.vmem [#allocation5], %s662_s11 }
  0x58   : > { %973 = dma.done.wait (%p1311_p6), %s227_s20, 256  }
  0x59   : > { %975 = vsyncadd (%p1311_p6), %s227_s20, 4294967040  ;;  %v1004_v0 = vmov 0   ;;  %v778_v1 = vld [vmem:[%s1176_s7 + $0x4] ss:$8 sps:$4 sm:$0xff]   ;;  %v780_v2 = vld [vmem:[%s1176_s7] ss:$8 sps:$4 sm:$0xff]  }
  0x5a   : > { %410 = vmatprep.mubr.bf16.mxu0 %v1004_v0  ;;  %420 = vmatprep.mubr.bf16.mxu1 %v1004_v0  ;;  %v781_v3 = vld [vmem:[%s1176_s7 + $0x14] ss:$8 sps:$4 sm:$0xff]   ;;  %v783_v4 = vld [vmem:[%s1176_s7 + $0x10] ss:$8 sps:$4 sm:$0xff]   ;;  %v784_v5 = vld [vmem:[%s1176_s7 + $0x24] ss:$8 sps:$4 sm:$0xff]  }
  0x5b   : > { %378 = vmatprep.subr.bf16.mxu0 %v778_v1  ;;  %703 = vmatprep.subr.bf16.mxu1 %v778_v1  ;;  %v786_v6 = vld [vmem:[%s1176_s7 + $0x20] ss:$8 sps:$4 sm:$0xff]   ;;  %v787_v7 = vld [vmem:[%s1176_s7 + $0x34] ss:$8 sps:$4 sm:$0xff]   ;;  %v789_v8 = vld [vmem:[%s1176_s7 + $0x30] ss:$8 sps:$4 sm:$0xff]  }
  0x5c   : > { %379 = vmatpush1.bf16.msra.mxu0 %v780_v2  ;;  %711 = vmatpush1.bf16.msra.mxu1 %v780_v2  ;;  %v790_v9 = vld [vmem:[%s1176_s7 + $0x44] ss:$8 sps:$4 sm:$0xff]   ;;  %v792_v10 = vld [vmem:[%s1176_s7 + $0x40] ss:$8 sps:$4 sm:$0xff]   ;;  %v793_v11 = vld [vmem:[%s1176_s7 + $0x54] ss:$8 sps:$4 sm:$0xff]  }
  0x5d   : > { %380 = vmatprep.subr.bf16.mxu0 %v781_v3  ;;  %704 = vmatprep.subr.bf16.mxu1 %v781_v3  ;;  %v795_v12 = vld [vmem:[%s1176_s7 + $0x50] ss:$8 sps:$4 sm:$0xff]   ;;  %v796_v13 = vld [vmem:[%s1176_s7 + $0x64] ss:$8 sps:$4 sm:$0xff]   ;;  %v798_v14 = vld [vmem:[%s1176_s7 + $0x60] ss:$8 sps:$4 sm:$0xff]  }
  0x5e   : > { %v799_v15 = vld [vmem:[%s1176_s7 + $0x74] ss:$8 sps:$4 sm:$0xff]   ;;  %v801_v16 = vld [vmem:[%s1176_s7 + $0x70] ss:$8 sps:$4 sm:$0xff]   ;;  %v802_v17 = vld [vmem:[%s1299_s2] sm:$0xff]   ;;  %s702_s13 = sshll.u32 %s1053_s19, 8 }
  0x5f   : > { %v803_v18 = vld [vmem:[%s1299_s2 + $0x8] sm:$0xff]   ;;  %v469_v46 = vld [vmem:[%s1186_s25] sm:$0xff]  ;;  %s264_s14 = scalar_lea.vmem [#allocation8], %s662_s11  ;;  %s1222_s30 = scalar_lea.hbm %s1301_s4, %s702_s13 }
  0x60   : > { %381 = vmatpush1.bf16.msra.mxu0 %v783_v4  ;;  %712 = vmatpush1.bf16.msra.mxu1 %v783_v4  ;;  %v470_v48 = vld [vmem:[%s1186_s25 + $0x8] sm:$0xff]  ;;  %s526_s29 = sshll.u32 %s264_s14, 4  ;;  %s498_s10 = scalar_lea.sflag [#allocation9], %s1172_s5  ;;  %s1224_s29 = int_to_ptr.vmem [resolvable:$true] %s526_s29 }
  0x61   : > { %382 = vmatprep.subr.bf16.mxu0 %v784_v5  ;;  %705 = vmatprep.subr.bf16.mxu1 %v784_v5  ;;  %s896_s12 = scalar_lea.vmem %s1224_s29, 256  ;;  %p1312_p1 = scmp.ne.s32.totalorder %s1306_s27, 0 }
  0x62   : > { %p897_p13 = scmp.ne.s32.totalorder %s1224_s29, %s896_s12  ;;  %s1005_s7 = smov [#allocation8]  }
  0x63   : > { %s900_s11 = sshll.u32 %s1005_s7, 4  ;;  %s901_s11 = int_to_ptr.vmem [resolvable:$false] %s900_s11 }
  0x64   : > { %383 = vmatpush1.bf16.msra.mxu0 %v786_v6  ;;  %713 = vmatpush1.bf16.msra.mxu1 %v786_v6  ;;  %p898_p11 = pnand %p897_p13, %p1312_p1  ;;  %s902_s20 = scalar_lea.vmem %s901_s11, 512 }
  0x65   : > { %384 = vmatprep.subr.bf16.mxu0 %v787_v7  ;;  %706 = vmatprep.subr.bf16.mxu1 %v787_v7  ;;  %p903_p5 = scmp.lt.s32.totalorder %s1224_s29, %s901_s11  ;;  %p904_p7 = scmp.lt.s32.totalorder %s902_s20, %s896_s12 }
  0x66   : > { %p899_p4 = pneg %p898_p11 }
  0x67   : > { %p905_p9 = por %p904_p7, %p903_p5 }
  0x68   : > { %385 = vmatpush1.bf16.msra.mxu0 %v789_v8  ;;  %714 = vmatpush1.bf16.msra.mxu1 %v789_v8 }
  0x69   : > { %386 = vmatprep.subr.bf16.mxu0 %v790_v9  ;;  %707 = vmatprep.subr.bf16.mxu1 %v790_v9  ;;  %p906_p3 = pnand %p905_p9, %p899_p4 }
  0x6c   : > { %387 = vmatpush1.bf16.msra.mxu0 %v792_v10  ;;  %715 = vmatpush1.bf16.msra.mxu1 %v792_v10 }
  0x6d   : > { %388 = vmatprep.subr.bf16.mxu0 %v793_v11  ;;  %708 = vmatprep.subr.bf16.mxu1 %v793_v11 }
  0x70   : > { %389 = vmatpush1.bf16.msra.mxu0 %v795_v12  ;;  %716 = vmatpush1.bf16.msra.mxu1 %v795_v12 }
  0x71   : > { %390 = vmatprep.subr.bf16.mxu0 %v796_v13  ;;  %709 = vmatprep.subr.bf16.mxu1 %v796_v13 }
  0x74   : > { %391 = vmatpush1.bf16.msra.mxu0 %v798_v14  ;;  %717 = vmatpush1.bf16.msra.mxu1 %v798_v14 }
  0x75   : > { %392 = vmatprep.subr.bf16.mxu0 %v799_v15  ;;  %710 = vmatprep.subr.bf16.mxu1 %v799_v15 }
  0x78   : > { %393 = vmatpush1.bf16.msra.mxu0 %v801_v16  ;;  %718 = vmatpush1.bf16.msra.mxu1 %v801_v16 }
  0x7b   : > { %411 = vmatmul.mubr.bf16.vlgmr.msra.gmra.mrb[0].mxu0 %v802_v17  ;;  %421 = vmatmul.mubr.bf16.vlgmr.msra.gmra.mrb[0].mxu1 %v803_v18 }
 0x14e   : > { %v412_v19 = vpop.f32.mrb[0].mxu0  ;;  %v422_v20 = vpop.f32.mrb[0].mxu1 }
 0x14f   : > { %v683_v21 = vmul.f32 -1.442695, %v412_v19  ;;  %v414_v22 = vpop.f32.mrb[1].mxu0  ;;  %v424_v23 = vpop.f32.mrb[1].mxu1  ;;  %v687_v31 = vmul.f32 -1.442695, %v422_v20 }
 0x150   : > { %v684_v24 = vmul.f32 -1.442695, %v414_v22  ;;  %v416_v25 = vpop.f32.mrb[2].mxu0  ;;  %v426_v26 = vpop.f32.mrb[2].mxu1  ;;  %v688_v32 = vmul.f32 -1.442695, %v424_v23 }
 0x151   : > { %804 = vpow2.f32 %v683_v21  ;;  %v685_v27 = vmul.f32 -1.442695, %v416_v25  ;;  %v418_v28 = vpop.f32.mrb[3].mxu0  ;;  %v428_v29 = vpop.f32.mrb[3].mxu1 }
 0x152   : > { %806 = vpow2.f32 %v684_v24  ;;  %v686_v30 = vmul.f32 -1.442695, %v418_v28 }
 0x153   : > { %808 = vpow2.f32 %v685_v27 }
 0x154   : > { %810 = vpow2.f32 %v686_v30 }
 0x155   : > { %812 = vpow2.f32 %v687_v31 }
 0x156   : > { %814 = vpow2.f32 %v688_v32 }
 0x157   : > { %816 = vtanh.f32 %v426_v26 }
 0x158   : > { %818 = vtanh.f32 %v428_v29 }
 0x15b   : > { %v805_v33 = vpop.eup %804 }
 0x15c   : > { %v807_v34 = vpop.eup %806  ;;  %v437_v35 = vadd.f32 1.0, %v805_v33 }
 0x15d   : > { %v809_v36 = vpop.eup %808  ;;  %v438_v37 = vadd.f32 1.0, %v807_v34 }
 0x15e   : > { %v811_v38 = vpop.eup %810  ;;  %820 = vrcp.f32 %v437_v35  ;;  %v449_v39 = vadd.f32 1.0, %v809_v36 }
 0x15f   : > { %822 = vrcp.f32 %v438_v37  ;;  %v450_v40 = vadd.f32 1.0, %v811_v38  ;;  %v813_v41 = vpop.eup %812 }
 0x160   : > { %824 = vrcp.f32 %v449_v39  ;;  %v815_v42 = vpop.eup %814  ;;  %v461_v49 = vadd.f32 1.0, %v813_v41 }
 0x161   : > { %826 = vrcp.f32 %v450_v40  ;;  %v817_v43 = vpop.eup %816  ;;  %v462_v52 = vadd.f32 1.0, %v815_v42 }
 0x162   : > { %v819_v44 = vpop.eup %818  ;;  %828 = vrcp.f32 %v461_v49 }
 0x163   : > { %830 = vrcp.f32 %v462_v52 }
 0x168   : > { %v821_v45 = vpop.eup %820 }
 0x169   : > { %v823_v47 = vpop.eup %822  ;;  %v473_v50 = vmul.f32 %v821_v45, %v817_v43 }
 0x16a   : > { %v825_v51 = vpop.eup %824  ;;  %v474_v53 = vmul.f32 %v823_v47, %v819_v44 }
 0x16b   : > { %v827_v54 = vpop.eup %826  ;;  %v471_v55 = vmul.f32 %v825_v51, %v469_v46 }
 0x16c   : > { %v472_v56 = vmul.f32 %v827_v54, %v470_v48 }
 0x16d   : > { %v475_v57 = vadd.f32 %v473_v50, %v471_v55 }
 0x16e   : > { %v476_v58 = vadd.f32 %v474_v53, %v472_v56 }
 0x16f   : > { %832 = vtanh.f32 %v475_v57  ;;  %490 = vst [vmem:[%s264_s14] sm:$0xff] %v475_v57 }
 0x170   : > { %834 = vtanh.f32 %v476_v58  ;;  %491 = vst [vmem:[%s264_s14 + $0x8] sm:$0xff] %v476_v58 }
 0x171   : > { %909 = shalt.err (!%p906_p3)
}
 0x172   : > { %s910_s25 = scalar_lea.hbm %s1222_s30, 256  ;;  %s914_s8 = scalar_lea.hbm %s1301_s4, 512 }
 0x173   : > { %p911_p12 = scmp.ne.s32.totalorder %s1222_s30, %s910_s25  ;;  %p915_p2 = scmp.lt.u32.totalorder %s1222_s30, %s1301_s4 }
 0x174   : > { %p916_p10 = scmp.lt.u32.totalorder %s914_s8, %s910_s25  ;;  %p918_p13 = scmp.lt.u32.totalorder %s910_s25, %s1222_s30 }
 0x175   : > { %p912_p8 = pnand %p911_p12, %p1312_p1 }
 0x176   : > { %p917_p6 = por %p916_p10, %p915_p2 }
 0x177   : > { %p913_p0 = pneg %p912_p8 }
 0x178   : > { %p919_p11 = por %p918_p13, %p917_p6 }
 0x17a   : > { %p920_p4 = pnand %p919_p11, %p913_p0 }
 0x17c   : > { %923 = shalt.err (!%p920_p4)
}
 0x17d   : > { %724 = dma.vmem_to_hbm [thread:$0]  (%p1312_p1), %s1224_s29, 256, %s1222_s30, %s498_s10   ;;  %v829_v59 = vpop.eup %828 }
 0x17e   : > { %s663_s14 = sshll.u32 %s1172_s5, 3  ;;  %v831_v60 = vpop.eup %830  ;;  %s701_s22 = sshll.u32 %s1053_s19, 7 }
 0x17f   : > { %v833_v61 = vpop.eup %832  ;;  %s257_s23 = scalar_lea.vmem [#allocation7], %s663_s14  ;;  %s1253_s20 = scalar_lea.hbm %s1300_s3, %s701_s22 }
 0x180   : > { %v835_v62 = vpop.eup %834  ;;  %v479_v63 = vmul.f32 %v833_v61, %v829_v59  ;;  %s512_s12 = sshll.u32 %s257_s23, 4  ;;  %s493_s29 = scalar_lea.sflag [#allocation4], %s1172_s5  ;;  %s1255_s12 = int_to_ptr.vmem [resolvable:$true] %s512_s12 }
 0x181   : > { %v480_v0 = vmul.f32 %v835_v62, %v831_v60  ;;  %s924_s30 = scalar_lea.vmem %s1255_s12, 128  ;;  %s1006_s19 = smov [#allocation7]  }
 0x182   : > { %p925_p5 = scmp.ne.s32.totalorder %s1255_s12, %s924_s30  ;;  %s928_s10 = sshll.u32 %s1006_s19, 4  ;;  %s929_s10 = int_to_ptr.vmem [resolvable:$false] %s928_s10 }
 0x183   : > { %v700_v1 = vpack.c.bf16 %v480_v0, %v479_v63  ;;  %s930_s25 = scalar_lea.vmem %s929_s10, 256  ;;  %p931_p3 = scmp.lt.s32.totalorder %s1255_s12, %s929_s10 }
 0x184   : > { %p926_p7 = pnand %p925_p5, %p1312_p1  ;;  %p932_p12 = scmp.lt.s32.totalorder %s930_s25, %s924_s30 }
 0x185   : > { %489 = vst [vmem:[%s257_s23] sm:$0xff] %v700_v1 }
 0x186   : > { %p927_p9 = pneg %p926_p7  ;;  %p933_p8 = por %p932_p12, %p931_p3 }
 0x188   : > { %p934_p0 = pnand %p933_p8, %p927_p9 }
 0x18a   : > { %937 = shalt.err (!%p934_p0)
}
 0x18b   : > { %s938_s5 = scalar_lea.hbm %s1253_s20, 128  ;;  %s942_s8 = scalar_lea.hbm %s1300_s3, 256 }
 0x18c   : > { %p939_p2 = scmp.ne.s32.totalorder %s1253_s20, %s938_s5  ;;  %p943_p13 = scmp.lt.u32.totalorder %s1253_s20, %s1300_s3 }
 0x18d   : > { %p944_p11 = scmp.lt.u32.totalorder %s942_s8, %s938_s5  ;;  %p946_p5 = scmp.lt.u32.totalorder %s938_s5, %s1253_s20 }
 0x18e   : > { %p940_p10 = pnand %p939_p2, %p1312_p1 }
 0x18f   : > { %p945_p4 = por %p944_p11, %p943_p13 }
 0x190   : > { %p941_p6 = pneg %p940_p10 }
 0x191   : > { %p947_p7 = por %p946_p5, %p945_p4 }
 0x193   : > { %p948_p9 = pnand %p947_p7, %p941_p6 }
 0x195   : > { %951 = shalt.err (!%p948_p9)
}
 0x196   : > { %723 = dma.vmem_to_hbm [thread:$0]  (%p1312_p1), %s1255_s12, 128, %s1253_s20, %s493_s29  }
 0x197 PF: > { %s538_s14 = sand.u32 1, %s986_s15   ;;  %p1313_p3 = scmp.ne.s32.totalorder %s1307_s28, 0 }
 0x198   : > { %p1314_p12 = scmp.ge.s32.totalorder %s998_s18, 2  ;;  %s539_s22 = scalar_lea.sflag [#allocation4], %s538_s14 }
 0x19a   : > { %p735_p8 = pnand %p1314_p12, %p1313_p3 }
 0x19c   : > { %977 = dma.done.wait (!%p735_p8), %s539_s22, 128  }
 0x19d   : > { %979 = vsyncadd (!%p735_p8), %s539_s22, 4294967168  ;;  %s548_s23 = scalar_lea.sflag [#allocation9], %s538_s14 }
 0x19e   : > { %981 = dma.done.wait (!%p735_p8), %s548_s23, 256  }
 0x19f   : > { %983 = vsyncadd (!%p735_p8), %s548_s23, 4294967040  ;;  %p24_p1 = scmp.ge.s32.totalorder %s1057_s21, 4   ;;  %s1315_s15 = smov %s990_s16 }
 0x1a0   : > { %s1316_s16 = smov %s994_s17  ;;  %s1317_s17 = smov %s1069_s24 }
 0x1a1   : > { %s1318_s18 = smov %s1057_s21  ;;  %26 = sbr.rel (!%p24_p1) target bundleno = 9 (0x9), region = 107 }
 0x1a8   :  { %553 = vsyncpa [#allocation3], 1 }
 0x1a9   :  { %555 = vsyncpa [#allocation3 + $0x1], 1 }
 0x1aa   :  { %556 = vsyncpa [#allocation6], 1 }
 0x1ab   :  { %558 = vsyncpa [#allocation6 + $0x1], 1 }
 0x1ac   :  { %559 = vsyncpa [#allocation4], 1 }
 0x1ad   :  { %561 = vsyncpa [#allocation4 + $0x1], 1 }
 0x1ae   :  { %562 = vsyncpa [#allocation9], 1 }
 0x1af   :  { %564 = vsyncpa [#allocation9 + $0x1], 1 }

</bundles_post_ra>
